<compile_context>
chip_gen: v6e
topology: v6e:2x2x1
jax: 0.10.0
libtpu: 0.0.40
codegen_flags: <defaults>
</compile_context>

<pallas_src>
import functools
import math

import jax
import jax.numpy as jnp
from jax.experimental import pallas as pl
from jax.experimental.pallas import tpu as pltpu

_MIB = 1024 * 1024


# --------------------------------------------------------------------------
# helpers
# --------------------------------------------------------------------------
def _round_up(x, m):
    return ((x + m - 1) // m) * m


def _cdiv(a, b):
    return -(-a // b)


def _bspec(shape, index_map, mode):
    """BlockSpec helper: only mention pipeline_mode when actually requested."""
    if mode is None:
        return pl.BlockSpec(shape, index_map)
    return pl.BlockSpec(shape, index_map, pipeline_mode=mode)


def _hw_config():
    """Generation-aware tiling defaults (review: v5e / v6e / v7x specific)."""
    kind = ""
    try:
        kind = jax.devices()[0].device_kind.lower()
    except Exception:  # no accelerator info -> conservative defaults
        pass
    if "v7" in kind:
        # v7x: 64 MiB/TC physical VMEM -> leave headroom; shrink tff before tm.
        return dict(gen="v7x", vmem_limit=52 * _MIB, tm=512, tff=256, row_align=256)
    if "v6" in kind or "trillium" in kind:
        # v6e: 128 MiB VMEM, 918 TF/s -> large row tiles when streaming weights.
        return dict(gen="v6e", vmem_limit=104 * _MIB, tm=1024, tff=1024, row_align=256)
    if "v5e" in kind or "v5 lite" in kind or "v5lite" in kind:
        # v5e: 128 MiB VMEM, 4x128x128 MXU -> 128-aligned tiles, tm >= 256.
        return dict(gen="v5e", vmem_limit=100 * _MIB, tm=256, tff=512, row_align=128)
    # v4 / v5p / unknown: conservative.
    return dict(gen="other", vmem_limit=64 * _MIB, tm=512, tff=512, row_align=128)


@functools.cache
def _buffered_one_supported():
    """One-time trace/compile-time capability probe for pl.Buffered(1).

    This replaces the previous broad try/except around the *executed* FFN
    kernel: the probe is a trivial dedicated kernel, so genuine errors in the
    real kernels are never masked.
    """
    try:
        def k(x_ref, o_ref):
            o_ref[...] = x_ref[...] + 1.0

        f = pl.pallas_call(
            k,
            out_shape=jax.ShapeDtypeStruct((16, 128), jnp.float32),
            grid=(2,),
            in_specs=[pl.BlockSpec((8, 128), lambda i: (0, 0),
                                   pipeline_mode=pl.Buffered(1))],
            out_specs=pl.BlockSpec((8, 128), lambda i: (i, 0)),
        )
        jax.block_until_ready(f(jnp.zeros((8, 128), jnp.float32)))
        return True
    except Exception:
        return False


# --------------------------------------------------------------------------
# FFN kernels
# --------------------------------------------------------------------------
def _ffn_kernel_resident(x_ref, w1_ref, b1_ref, w2_ref, b2_ref, o_ref):
    """Whole d_ff resident in VMEM: one row tile -> output tile in one shot."""
    x = x_ref[...].astype(w1_ref.dtype)                       # cast in-kernel
    h = jnp.dot(x, w1_ref[...], preferred_element_type=jnp.float32)
    h = jnp.maximum(h + b1_ref[...], 0.0)
    # TODO(synk): dropout omitted (identity / eval-mode semantics).
    y = jnp.dot(h.astype(w2_ref.dtype), w2_ref[...],
                preferred_element_type=jnp.float32) + b2_ref[...]
    o_ref[...] = y.astype(o_ref.dtype)


def _ffn_kernel_tiled_f32out(x_ref, w1_ref, b1_ref, w2_ref, b2_ref, o_ref):
    """d_ff tiled, f32 output: partial products accumulate directly in o_ref."""
    f = pl.program_id(1)
    x = x_ref[...].astype(w1_ref.dtype)
    h = jnp.dot(x, w1_ref[...], preferred_element_type=jnp.float32)
    h = jnp.maximum(h + b1_ref[...], 0.0)
    part = jnp.dot(h.astype(w2_ref.dtype), w2_ref[...],
                   preferred_element_type=jnp.float32)

    @pl.when(f == 0)
    def _():
        o_ref[...] = part          # first partial written directly (no zero-init)

    @pl.when(f != 0)
    def _():
        o_ref[...] += part

    @pl.when(f == pl.num_programs(1) - 1)
    def _():
        o_ref[...] += b2_ref[...]


def _ffn_kernel_tiled_acc(x_ref, w1_ref, b1_ref, w2_ref, b2_ref, o_ref, acc_ref):
    """d_ff tiled, non-f32 output: f32 accumulator scratch, cast at the end."""
    f = pl.program_id(1)
    x = x_ref[...].astype(w1_ref.dtype)
    h = jnp.dot(x, w1_ref[...], preferred_element_type=jnp.float32)
    h = jnp.maximum(h + b1_ref[...], 0.0)
    part = jnp.dot(h.astype(w2_ref.dtype), w2_ref[...],
                   preferred_element_type=jnp.float32)

    @pl.when(f == 0)
    def _():
        acc_ref[...] = part

    @pl.when(f != 0)
    def _():
        acc_ref[...] += part

    @pl.when(f == pl.num_programs(1) - 1)
    def _():
        o_ref[...] = (acc_ref[...] + b2_ref[...]).astype(o_ref.dtype)


# --------------------------------------------------------------------------
# FFN tiling plan + wrapper
# --------------------------------------------------------------------------
def _plan_ffn(n, d_model, d_ff, in_isz, w_isz, out_isz, tm_req, tff_req, cfg,
              single_weight_copy):
    budget = int(cfg["vmem_limit"] * 0.85)       # headroom for compiler scratch
    wfac = 1 if single_weight_copy else 2

    n16 = _round_up(max(n, 1), 16)               # bf16 sublane packing (review)
    tm = _round_up(tm_req if tm_req else cfg["tm"], 16)
    if n16 <= tm:
        tm = n16                                 # one row tile, minimal padding
    elif tm >= cfg["row_align"] and tm % cfg["row_align"] != 0:
        tm = _round_up(tm, cfg["row_align"])     # MXU-shape aligned full tiles

    # v7x megacore: prefer an even number of row tiles so both TCs stay busy.
    if cfg["gen"] == "v7x" and n16 > tm:
        nrt = _cdiv(n16, tm)
        if nrt > 1 and nrt % 2 == 1:
            tm_alt = _round_up(_cdiv(n16, nrt + 1), 16)
            if tm_alt >= 256:
                tm = tm_alt

    def resident_bytes(tm_):
        return (2 * tm_ * d_model * in_isz            # double-buffered x rows
                + 2 * tm_ * d_model * out_isz         # double-buffered out rows
                + tm_ * d_ff * 4                      # f32 hidden intermediate
                + wfac * 2 * d_model * d_ff * w_isz   # resident W1 + W2
                + (d_ff + d_model) * 4)               # biases

    def tiled_bytes(tm_, tff_):
        return (2 * tm_ * d_model * in_isz
                + 2 * tm_ * d_model * out_isz
                + tm_ * tff_ * 4                      # f32 hidden slice
                + tm_ * d_model * 4                   # accumulator / f32 partials
                + 2 * (2 * d_model * tff_ * w_isz + tff_ * 4)   # W1/W2/b1 slices
                + 2 * d_model * 4)                    # b2

    force_tiled = (tff_req is not None) and (tff_req < d_ff)

    if not force_tiled:
        # Weights-resident path decided from actual footprint (review);
        # shrink tm (floor 256) before giving up on residency.
        tm_r = tm
        floor = min(256, n16)
        while resident_bytes(tm_r) > budget and tm_r > floor:
            tm_r = max(floor, _round_up(tm_r // 2, 16))
        if resident_bytes(tm_r) <= budget:
            return dict(resident=True, tm=tm_r, tff=d_ff, d_ff_p=d_ff,
                        n_p=_round_up(n, tm_r))

    # Tiled-d_ff path: pick tff dividing d_ff (no weight padding when d_ff is
    # 128-aligned); shrink tff before tm when VMEM is tight (review).
    tff_target = min(max(128, tff_req if tff_req else cfg["tff"]), d_ff)
    nt = _cdiv(d_ff, tff_target)
    tff = _round_up(_cdiv(d_ff, nt), 128)
    while tiled_bytes(tm, tff) > budget and tff > 128:
        tff = max(128, _round_up(tff // 2, 128))
    while tiled_bytes(tm, tff) > budget and tm > 16:
        tm = max(16, _round_up(tm // 2, 16))
    d_ff_p = _cdiv(d_ff, tff) * tff
    return dict(resident=False, tm=tm, tff=tff, d_ff_p=d_ff_p,
                n_p=_round_up(n, tm))


def prepare_ffn_params(w1, b1, w2, b2, use_bf16=True):
    """Cast / reshape FFN params ONCE (review: no per-call pad/cast passes).

    w1: (d_model, d_ff), w2: (d_ff, d_model)  — already (in, out) layout.
    Biases stay f32 (bias + ReLU run in f32 on the VPU).
    """
    mxu_dtype = jnp.bfloat16 if use_bf16 else w1.dtype
    return (jnp.asarray(w1, mxu_dtype),
            jnp.asarray(b1, jnp.float32).reshape(1, -1),
            jnp.asarray(w2, mxu_dtype),
            jnp.asarray(b2, jnp.float32).reshape(1, -1))


def ffn_forward(x, w1, b1_2d, w2, b2_2d, *, tm=None, tff=None,
                single_buffer_weights=True, vmem_limit_bytes=None,
                out_dtype=None):
    """Positionwise FFN forward with params from prepare_ffn_params."""
    orig_shape = x.shape
    d_model = orig_shape[-1]
    d_ff = w1.shape[1]
    n = math.prod(orig_shape[:-1])
    out_dtype = jnp.dtype(out_dtype) if out_dtype is not None else jnp.dtype(x.dtype)

    cfg = _hw_config()
    vmem_limit = int(vmem_limit_bytes) if vmem_limit_bytes else cfg["vmem_limit"]
    cfg = dict(cfg, vmem_limit=vmem_limit)

    buffered = bool(single_buffer_weights) and _buffered_one_supported()
    plan = _plan_ffn(n, d_model, d_ff,
                     in_isz=jnp.dtype(x.dtype).itemsize,
                     w_isz=jnp.dtype(w1.dtype).itemsize,
                     out_isz=out_dtype.itemsize,
                     tm_req=tm, tff_req=tff, cfg=cfg,
                     single_weight_copy=buffered)
    tm_, tff_ = plan["tm"], plan["tff"]
    n_p, d_ff_p = plan["n_p"], plan["d_ff_p"]
    resident = plan["resident"]

    x2d = x.reshape(n, d_model)
    if n_p != n:
        x2d = jnp.pad(x2d, ((0, n_p - n), (0, 0)))
    if d_ff_p != d_ff:
        # Rare (d_ff not 128-aligned): zero padding is exact for a ReLU FFN.
        w1 = jnp.pad(w1, ((0, 0), (0, d_ff_p - d_ff)))
        b1_2d = jnp.pad(b1_2d, ((0, 0), (0, d_ff_p - d_ff)))
        w2 = jnp.pad(w2, ((0, d_ff_p - d_ff), (0, 0)))

    num_row_tiles = n_p // tm_
    num_ff_tiles = d_ff_p // tff_

    cost = pl.CostEstimate(
        flops=int(4 * n * d_model * d_ff),
        transcendentals=0,
        bytes_accessed=int(
            n_p * d_model * (jnp.dtype(x.dtype).itemsize + out_dtype.itemsize)
            + 2 * d_model * d_ff_p * jnp.dtype(w1.dtype).itemsize
              * (1 if resident else num_row_tiles)
            + (d_ff_p + d_model) * 4))

    cparams = pltpu.CompilerParams(
        dimension_semantics=("parallel",) if resident else ("parallel", "arbitrary"),
        vmem_limit_bytes=vmem_limit)

    inv = pl.Buffered(1) if buffered else None       # grid-invariant blocks

    if resident:
        kernel = _ffn_kernel_resident
        grid_spec = pltpu.PrefetchScalarGridSpec(
            num_scalar_prefetch=0,
            grid=(num_row_tiles,),
            in_specs=[
                pl.BlockSpec((tm_, d_model), lambda i: (i, 0)),         # x rows
                _bspec((d_model, d_ff_p), lambda i: (0, 0), inv),       # W1
                _bspec((1, d_ff_p), lambda i: (0, 0), inv),             # b1
                _bspec((d_ff_p, d_model), lambda i: (0, 0), inv),       # W2
                _bspec((1, d_model), lambda i: (0, 0), inv),            # b2
            ],
            out_specs=pl.BlockSpec((tm_, d_model), lambda i: (i, 0)),
        )
    else:
        # Streamed W1/W2/b1 slices keep default double-buffering (review);
        # only the truly grid-invariant b2 is single-buffered.
        in_specs = [
            pl.BlockSpec((tm_, d_model), lambda i, f: (i, 0)),          # x rows
            pl.BlockSpec((d_model, tff_), lambda i, f: (0, f)),         # W1 slice
            pl.BlockSpec((1, tff_), lambda i, f: (0, f)),               # b1 slice
            pl.BlockSpec((tff_, d_model), lambda i, f: (f, 0)),         # W2 slice
            _bspec((1, d_model), lambda i, f: (0, 0), inv),             # b2
        ]
        out_spec = pl.BlockSpec((tm_, d_model), lambda i, f: (i, 0))
        if out_dtype == jnp.float32:
            kernel = _ffn_kernel_tiled_f32out
            scratch = ()
        else:
            kernel = _ffn_kernel_tiled_acc
            scratch = (pltpu.VMEM((tm_, d_model), jnp.float32),)
        grid_spec = pltpu.PrefetchScalarGridSpec(
            num_scalar_prefetch=0,
            grid=(num_row_tiles, num_ff_tiles),
            in_specs=in_specs,
            out_specs=out_spec,
            scratch_shapes=scratch)

    out2d = pl.pallas_call(
        kernel,
        out_shape=jax.ShapeDtypeStruct((n_p, d_model), out_dtype),
        grid_spec=grid_spec,
        compiler_params=cparams,
        cost_estimate=cost,
    )(x2d, w1, b1_2d, w2, b2_2d)

    return out2d[:n].reshape(orig_shape)


def positionwise_ffn(x, w1, b1, w2, b2, *, use_bf16=True, **kwargs):
    """Convenience wrapper (prepares params per call — tests only; for repeated
    calls prepare once via prepare_ffn_params / PallasEncoder)."""
    params = prepare_ffn_params(w1, b1, w2, b2, use_bf16=use_bf16)
    return ffn_forward(x, *params, **kwargs)


# --------------------------------------------------------------------------
# LayerNorm kernel (PyTorch semantics: unbiased std, eps added to std)
# --------------------------------------------------------------------------
def _layernorm_kernel(x_ref, g_ref, b_ref, o_ref, *, eps, features):
    x = x_ref[...].astype(jnp.float32)
    mean = jnp.mean(x, axis=-1, keepdims=True)
    xc = x - mean
    var = jnp.sum(xc * xc, axis=-1, keepdims=True) * (1.0 / max(features - 1, 1))
    std = jnp.sqrt(var)
    y = g_ref[...] * (xc / (std + eps)) + b_ref[...]
    o_ref[...] = y.astype(o_ref.dtype)


def layer_norm(x, gamma, beta, *, eps=1e-6, tm=None, vmem_limit_bytes=None):
    orig_shape = x.shape
    d = orig_shape[-1]
    n = math.prod(orig_shape[:-1])
    cfg = _hw_config()
    vmem_limit = int(vmem_limit_bytes) if vmem_limit_bytes else cfg["vmem_limit"]

    if tm is None:
        tm = min(_round_up(n, 16), 1024)
    tm = max(16, _round_up(tm, 16))
    n_p = _round_up(n, tm)

    x2d = x.reshape(n, d)
    if n_p != n:
        x2d = jnp.pad(x2d, ((0, n_p - n), (0, 0)))
    g2 = jnp.asarray(gamma, jnp.float32).reshape(1, d)
    b2 = jnp.asarray(beta, jnp.float32).reshape(1, d)

    kernel = functools.partial(_layernorm_kernel, eps=float(eps), features=int(d))
    out2d = pl.pallas_call(
        kernel,
        out_shape=jax.ShapeDtypeStruct((n_p, d), x.dtype),
        grid_spec=pltpu.PrefetchScalarGridSpec(
            num_scalar_prefetch=0,
            grid=(n_p // tm,),
            in_specs=[pl.BlockSpec((tm, d), lambda i: (i, 0)),
                      pl.BlockSpec((1, d), lambda i: (0, 0)),
                      pl.BlockSpec((1, d), lambda i: (0, 0))],
            out_specs=pl.BlockSpec((tm, d), lambda i: (i, 0))),
        compiler_params=pltpu.CompilerParams(
            dimension_semantics=("parallel",),
            vmem_limit_bytes=vmem_limit),
    )(x2d, g2, b2)
    return out2d[:n].reshape(orig_shape)


# --------------------------------------------------------------------------
# Encoder: N cloned layers + final LayerNorm (mirrors the PyTorch module)
# --------------------------------------------------------------------------
class PallasEncoder:
    def __init__(self, d_model, d_ff, N, layer_params, *, eps=1e-6, use_bf16=True):
        w1, b1, w2, b2 = layer_params
        prepared = prepare_ffn_params(w1, b1, w2, b2, use_bf16=use_bf16)
        # clones(): N identical deep copies -> N identical prepared param sets.
        self.layers = [prepared] * N
        self.norm_gamma = jnp.ones((d_model,), jnp.float32)   # LayerNorm a_2
        self.norm_beta = jnp.zeros((d_model,), jnp.float32)   # LayerNorm b_2
        self.eps = eps

    def __call__(self, x, mask=None, **ffn_kwargs):
        # TODO(synk): the EncoderLayer internals (self-attention + residual
        # sublayers) are not defined in the provided module; `mask` is unused.
        for (w1, b1, w2, b2) in self.layers:
            x = ffn_forward(x, w1, b1, w2, b2, **ffn_kwargs)
        return layer_norm(x, self.norm_gamma, self.norm_beta, eps=self.eps)


# --------------------------------------------------------------------------
# references + demo
# --------------------------------------------------------------------------
def _init_ffn_params(key, d_model, d_ff, dtype=jnp.float32):
    """nn.Linear-style init (uniform +/- 1/sqrt(fan_in)); weights stored (in, out)."""
    k1, k2, k3, k4 = jax.random.split(key, 4)
    a1 = 1.0 / math.sqrt(d_model)
    a2 = 1.0 / math.sqrt(d_ff)
    w1 = jax.random.uniform(k1, (d_model, d_ff), dtype, -a1, a1)
    b1 = jax.random.uniform(k2, (d_ff,), dtype, -a1, a1)
    w2 = jax.random.uniform(k3, (d_ff, d_model), dtype, -a2, a2)
    b2 = jax.random.uniform(k4, (d_model,), dtype, -a2, a2)
    return w1, b1, w2, b2


def _ffn_ref(x, w1, b1, w2, b2):
    return jnp.maximum(x @ w1 + b1, 0.0) @ w2 + b2


def _ffn_ref_cast(x, w1, b1, w2, b2, dtype):
    """Reference emulating the kernel numerics: cast operands, f32 accumulate."""
    h = jnp.dot(x.astype(dtype), w1.astype(dtype),
                preferred_element_type=jnp.float32)
    h = jnp.maximum(h + b1, 0.0)
    return jnp.dot(h.astype(dtype), w2.astype(dtype),
                   preferred_element_type=jnp.float32) + b2


def _layernorm_ref(x, gamma, beta, eps=1e-6):
    mean = x.mean(-1, keepdims=True)
    xc = x - mean
    var = (xc * xc).sum(-1, keepdims=True) / (x.shape[-1] - 1)   # unbiased std
    return gamma * xc / (jnp.sqrt(var) + eps) + beta


if __name__ == "__main__":
    key = jax.random.PRNGKey(0)
    kx, kp, kx2, kp2, kx3, kp3 = jax.random.split(key, 6)

    # ---------------- Encoder: N cloned layers + final LayerNorm ------------
    batch, seq, d_model, d_ff, N = 2, 8, 32, 64, 2
    x = jax.random.normal(kx, (batch, seq, d_model), jnp.float32)
    mask = jnp.ones((batch, 1, seq), jnp.float32)      # accepted, unused
    params = _init_ffn_params(kp, d_model, d_ff)

    enc_f32 = PallasEncoder(d_model, d_ff, N, params, use_bf16=False)
    out_f32 = jax.block_until_ready(enc_f32(x, mask))
    ref_f32 = x
    for _ in range(N):
        ref_f32 = _ffn_ref(ref_f32, *params)
    ref_f32 = _layernorm_ref(ref_f32, enc_f32.norm_gamma, enc_f32.norm_beta)
    assert out_f32.shape == (batch, seq, d_model)
    assert jnp.allclose(out_f32, ref_f32, atol=1e-4, rtol=1e-4), \
        float(jnp.max(jnp.abs(out_f32 - ref_f32)))

    enc_bf16 = PallasEncoder(d_model, d_ff, N, params, use_bf16=True)
    out_bf16 = jax.block_until_ready(enc_bf16(x, mask))
    ref_bf16 = x
    for _ in range(N):
        ref_bf16 = _ffn_ref_cast(ref_bf16, *params, jnp.bfloat16)
    ref_bf16 = _layernorm_ref(ref_bf16, enc_bf16.norm_gamma, enc_bf16.norm_beta)
    assert jnp.allclose(out_bf16, ref_bf16, atol=5e-3, rtol=5e-3), \
        float(jnp.max(jnp.abs(out_bf16 - ref_bf16)))

    # ---------------- FFN sublayer: resident-weights path, f32 parity -------
    ffn_ref1 = _ffn_ref(x, *params)
    out1 = jax.block_until_ready(positionwise_ffn(x, *params, use_bf16=False))
    assert jnp.allclose(out1, ffn_ref1, atol=2e-5, rtol=2e-5), \
        float(jnp.max(jnp.abs(out1 - ffn_ref1)))

    # ---------------- FFN sublayer: forced tiled-d_ff path + row padding ----
    # (f32 output -> partials accumulate directly into o_ref, no scratch)
    b2_, s2_, dm2, dff2 = 2, 200, 128, 256
    x2 = jax.random.normal(kx2, (b2_, s2_, dm2), jnp.float32)
    p2 = _init_ffn_params(kp2, dm2, dff2)
    out2 = jax.block_until_ready(positionwise_ffn(x2, *p2, use_bf16=True, tff=128))
    assert out2.shape == (b2_, s2_, dm2)
    ref2c = _ffn_ref_cast(x2, *p2, jnp.bfloat16)
    assert jnp.allclose(out2, ref2c, atol=5e-3, rtol=5e-3), \
        float(jnp.max(jnp.abs(out2 - ref2c)))
    assert jnp.allclose(out2, _ffn_ref(x2, *p2), atol=3e-2, rtol=3e-2)

    # ---------------- FFN sublayer: tiled path with bf16 output -------------
    # (exercises the f32 accumulator-scratch variant)
    b3_, s3_, dm3, dff3 = 2, 16, 128, 256
    x3 = jax.random.normal(kx3, (b3_, s3_, dm3), jnp.float32).astype(jnp.bfloat16)
    p3 = _init_ffn_params(kp3, dm3, dff3)
    out3 = jax.block_until_ready(positionwise_ffn(x3, *p3, use_bf16=True, tff=128))
    assert out3.dtype == jnp.bfloat16
    ref3c = _ffn_ref_cast(x3, *p3, jnp.bfloat16)
    assert jnp.allclose(out3.astype(jnp.float32), ref3c, atol=2e-2, rtol=2e-2), \
        float(jnp.max(jnp.abs(out3.astype(jnp.float32) - ref3c)))

    print("KERNEL_OK")
</pallas_src>

<mosaic_0001>
module attributes {stable_mosaic.version = 11 : i64} {
  func.func @k(%arg0: i32, %arg1: memref<8x128xf32, #tpu.memory_space<vmem>>, %arg2: memref<8x128xf32, #tpu.memory_space<vmem>>) attributes {dimension_semantics = [#tpu.dimension_semantics<arbitrary>], iteration_bounds = array<i64: 2>, scalar_prefetch = 0 : i64, scratch_operands = 0 : i64, tpu.core_type = #tpu.core_type<tc>, window_params = [{pipeline_mode = #tpu.pipeline_mode<synchronous>, transform_indices = @transform_0, window_bounds = array<i64: 8, 128>}, {transform_indices = @transform_1, window_bounds = array<i64: 8, 128>}]} {
    %c0 = arith.constant 0 : index
    %c0_0 = arith.constant 0 : index
    %0 = vector.load %arg1[%c0, %c0_0] : memref<8x128xf32, #tpu.memory_space<vmem>>, vector<8x128xf32>
    %cst = arith.constant 1.000000e+00 : f32
    %1 = vector.broadcast %cst : f32 to vector<8x128xf32>
    %2 = arith.addf %0, %1 : vector<8x128xf32>
    %c0_1 = arith.constant 0 : index
    %c0_2 = arith.constant 0 : index
    %3 = vector.load %arg2[%c0_1, %c0_2] : memref<8x128xf32, #tpu.memory_space<vmem>>, vector<8x128xf32>
    tpu.vector_store %arg2[%c0_1, %c0_2], %2 {strides = array<i32>} : memref<8x128xf32, #tpu.memory_space<vmem>>, vector<8x128xf32>,
    return
  }
  func.func @transform_0(%arg0: i32) -> (i32, i32) {
    %c0_i32 = arith.constant 0 : i32
    %c0_i32_0 = arith.constant 0 : i32
    %c0_i32_1 = arith.constant 0 : i32
    return %c0_i32, %c0_i32_0 : i32, i32
  }
  func.func @transform_1(%arg0: i32) -> (i32, i32) {
    %c0_i32 = arith.constant 0 : i32
    %c0_i32_0 = arith.constant 0 : i32
    return %arg0, %c0_i32 : i32, i32
  }
}

module attributes {stable_mosaic.version = 11 : i64} {
  func.func @_ffn_kernel_resident(%arg0: i32, %arg1: memref<16x32xf32, #tpu.memory_space<vmem>>, %arg2: memref<32x64xf32, #tpu.memory_space<vmem>>, %arg3: memref<1x64xf32, #tpu.memory_space<vmem>>, %arg4: memref<64x32xf32, #tpu.memory_space<vmem>>, %arg5: memref<1x32xf32, #tpu.memory_space<vmem>>, %arg6: memref<16x32xf32, #tpu.memory_space<vmem>>) attributes {dimension_semantics = [#tpu.dimension_semantics<parallel>], iteration_bounds = array<i64: 1>, scalar_prefetch = 0 : i64, scratch_operands = 0 : i64, tpu.core_type = #tpu.core_type<tc>, window_params = [{transform_indices = @transform_0, window_bounds = array<i64: 16, 32>}, {pipeline_mode = #tpu.pipeline_mode<synchronous>, transform_indices = @transform_1, window_bounds = array<i64: 32, 64>}, {pipeline_mode = #tpu.pipeline_mode<synchronous>, transform_indices = @transform_2, window_bounds = array<i64: 1, 64>}, {pipeline_mode = #tpu.pipeline_mode<synchronous>, transform_indices = @transform_3, window_bounds = array<i64: 64, 32>}, {pipeline_mode = #tpu.pipeline_mode<synchronous>, transform_indices = @transform_4, window_bounds = array<i64: 1, 32>}, {transform_indices = @transform_5, window_bounds = array<i64: 16, 32>}]} {
    %c0 = arith.constant 0 : index
    %c0_0 = arith.constant 0 : index
    %0 = vector.load %arg1[%c0, %c0_0] : memref<16x32xf32, #tpu.memory_space<vmem>>, vector<16x32xf32>
    %c0_1 = arith.constant 0 : index
    %c0_2 = arith.constant 0 : index
    %1 = vector.load %arg2[%c0_1, %c0_2] : memref<32x64xf32, #tpu.memory_space<vmem>>, vector<32x64xf32>
    %cst = arith.constant dense<0.000000e+00> : vector<16x64xf32>
    %2 = tpu.matmul %0, %1, %cst {dimension_numbers = #tpu.dot_dimension_numbers<[1], [0], [0], [1], [0, 0, 1, 1], [], []>} : vector<16x32xf32>, vector<32x64xf32>, vector<16x64xf32> -> vector<16x64xf32>
    %c0_3 = arith.constant 0 : index
    %c0_4 = arith.constant 0 : index
    %3 = vector.load %arg3[%c0_3, %c0_4] : memref<1x64xf32, #tpu.memory_space<vmem>>, vector<1x64xf32>
    %4 = vector.broadcast %3 : vector<1x64xf32> to vector<16x64xf32>
    %5 = arith.addf %2, %4 : vector<16x64xf32>
    %cst_5 = arith.constant 0.000000e+00 : f32
    %6 = vector.broadcast %cst_5 : f32 to vector<16x64xf32>
    %7 = arith.maximumf %5, %6 : vector<16x64xf32>
    %c0_6 = arith.constant 0 : index
    %c0_7 = arith.constant 0 : index
    %8 = vector.load %arg4[%c0_6, %c0_7] : memref<64x32xf32, #tpu.memory_space<vmem>>, vector<64x32xf32>
    %cst_8 = arith.constant dense<0.000000e+00> : vector<16x32xf32>
    %9 = tpu.matmul %7, %8, %cst_8 {dimension_numbers = #tpu.dot_dimension_numbers<[1], [0], [0], [1], [0, 0, 1, 1], [], []>} : vector<16x64xf32>, vector<64x32xf32>, vector<16x32xf32> -> vector<16x32xf32>
    %c0_9 = arith.constant 0 : index
    %c0_10 = arith.constant 0 : index
    %10 = vector.load %arg5[%c0_9, %c0_10] : memref<1x32xf32, #tpu.memory_space<vmem>>, vector<1x32xf32>
    %11 = vector.broadcast %10 : vector<1x32xf32> to vector<16x32xf32>
    %12 = arith.addf %9, %11 : vector<16x32xf32>
    %c0_11 = arith.constant 0 : index
    %c0_12 = arith.constant 0 : index
    %13 = vector.load %arg6[%c0_11, %c0_12] : memref<16x32xf32, #tpu.memory_space<vmem>>, vector<16x32xf32>
    tpu.vector_store %arg6[%c0_11, %c0_12], %12 {strides = array<i32>} : memref<16x32xf32, #tpu.memory_space<vmem>>, vector<16x32xf32>,
    return
  }
  func.func @transform_0(%arg0: i32) -> (i32, i32) {
    %c0_i32 = arith.constant 0 : i32
    %c0_i32_0 = arith.constant 0 : i32
    return %arg0, %c0_i32 : i32, i32
  }
  func.func @transform_1(%arg0: i32) -> (i32, i32) {
    %c0_i32 = arith.constant 0 : i32
    %c0_i32_0 = arith.constant 0 : i32
    %c0_i32_1 = arith.constant 0 : i32
    return %c0_i32, %c0_i32_0 : i32, i32
  }
  func.func @transform_2(%arg0: i32) -> (i32, i32) {
    %c0_i32 = arith.constant 0 : i32
    %c0_i32_0 = arith.constant 0 : i32
    %c0_i32_1 = arith.constant 0 : i32
    return %c0_i32, %c0_i32_0 : i32, i32
  }
  func.func @transform_3(%arg0: i32) -> (i32, i32) {
    %c0_i32 = arith.constant 0 : i32
    %c0_i32_0 = arith.constant 0 : i32
    %c0_i32_1 = arith.constant 0 : i32
    return %c0_i32, %c0_i32_0 : i32, i32
  }
  func.func @transform_4(%arg0: i32) -> (i32, i32) {
    %c0_i32 = arith.constant 0 : i32
    %c0_i32_0 = arith.constant 0 : i32
    %c0_i32_1 = arith.constant 0 : i32
    return %c0_i32, %c0_i32_0 : i32, i32
  }
  func.func @transform_5(%arg0: i32) -> (i32, i32) {
    %c0_i32 = arith.constant 0 : i32
    %c0_i32_0 = arith.constant 0 : i32
    return %arg0, %c0_i32 : i32, i32
  }
}

</mosaic_0001>

<bundles_post_ra>
// kernel: tpu_custom_call.1
= control target key start
LH: loop header
LB: loop body
LE: loop exit
PB: predicated region body
PF: predicated region fallthrough
CT: control target
= control target key end

     0   :  { %6 = vsyncpa [#allocation3], 0  ;;  %s448_s0 = inlined_call_operand.hbm [shape: f32[8,128], index: 0, kind: input, shape index: {}]   ;;  %s449_s1 = inlined_call_operand.hbm [shape: f32[16,128], index: 1, kind: output, shape index: {}]  }
   0x1   :  { %7 = vsyncpa [#allocation4], 0 }
   0x2   :  { %9 = vsyncpa [#allocation4 + $0x1], 0  ;;  %s348_s6 = smov 0   ;;  %s350_s7 = smov 0  }
   0x3   :  { %s352_s8 = smov 0   ;;  %s354_s9 = smov 0  }
   0x4 LB: > { %s369_s10 = sadd.s32 4294967295, %s334_s9   ;;  %s184_s11 = sadd.s32 4294967294, %s334_s9   ;;  %s334_s9 = sphi %s354_s9, %s457_s9   ;;  %s330_s8 = sphi %s352_s8, %s456_s8   ;;  %s326_s7 = sphi %s350_s7, %s455_s7   ;;  %s322_s6 = sphi %s348_s6, %s454_s6  }
   0x5   : > { %s373_s12 = sadd.s32 1, %s334_s9   ;;  %s43_s13 = sadd.s32 1, %s330_s8 }
   0x6   : > { %s40_s14 = ssub.s32 %s334_s9, %s373_s12  ;;  %p53_p0 = scmp.ne.s32.totalorder %s330_s8, %s326_s7 }
   0x7   : > { %p41_p1 = scmp.eq.s32.totalorder %s40_s14, 0  ;;  %p54_p2 = scmp.eq.s32.totalorder %s369_s10, 1 }
   0x8   : > { %p59_p3 = scmp.ne.s32.totalorder %s326_s7, %s322_s6  ;;  %p60_p4 = scmp.eq.s32.totalorder %s184_s11, 1 }
   0x9   : > { %s384_s15 = scalar_select %p41_p1, %s330_s8, %s43_s13  }
   0xa   : > { %p386_p5 = por %p54_p2, %p53_p0  ;;  %p390_p6 = por %p60_p4, %p59_p3 }
   0xb   : > { %p185_p7 = scmp.ge.s32.totalorder %s334_s9, 1  ;;  %p67_p8 = scmp.lt.s32.totalorder %s334_s9, 3 }
   0xc   : > { %s451_s17 = scalar_select %p390_p6, 1, 0 }
   0xd   : > { %p208_p9 = scmp.eq.s32.totalorder %s369_s10, 0  ;;  %p397_p10 = pnand %p185_p7, %p67_p8 }
   0xe   : > { %s336_s19 = smov [#allocation2]  }
   0xf   : > { %s80_s20 = sshll.u32 %s336_s19, 4  ;;  %p200_p11 = pneg %p397_p10  ;;  %s81_s20 = int_to_ptr.vmem [resolvable:$true] %s80_s20 }
  0x10   : > { %s255_s21 = scalar_lea.vmem %s81_s20, 128  ;;  %p263_p3 = scmp.lt.s32.totalorder %s81_s20, %s81_s20 }
  0x11   : > { %p201_p12 = pnand %p208_p9, %p200_p11  ;;  %p256_p0 = scmp.ne.s32.totalorder %s81_s20, %s255_s21 }
  0x12   : > { %p264_p4 = scmp.lt.s32.totalorder %s255_s21, %s255_s21 }
  0x13   : > { %p246_p13 = pneg %p201_p12 }
  0x14   : > { %p265_p6 = por %p264_p4, %p263_p3 }
  0x15   : > { %p258_p1 = pnand %p256_p0, %p246_p13 }
  0x17   : > { %p259_p2 = pneg %p258_p1 }
  0x19   : > { %p266_p7 = pnand %p265_p6, %p259_p2 }
  0x1b   : > { %269 = shalt.err (!%p266_p7)
}
  0x1c   : > { %203 = dma.hbm_to_vmem [thread:$0]  (!%p201_p12), %s448_s0, 128, %s81_s20, [#allocation3]  }
  0x1d   : > { %93 = sbr.rel (%p397_p10) target bundleno = 60 (0x3c), region = 24 }
  0x22   : > { %313 = dma.done.wait (%p208_p9), [#allocation3], 128  }
  0x23   : > { %315 = vsyncadd (%p208_p9), [#allocation3], 4294967168  ;;  %s105_s24 = sand.u32 1, %s326_s7   ;;  %s191_s28 = sshll.u32 %s369_s10, 7  ;;  %v108_v0 = vld [vmem:[#allocation2] sm:$0xff] }
  0x24   : > { %s189_s25 = sshll.u32 %s105_s24, 3  ;;  %v109_v1 = vadd.f32 1.0, %v108_v0  ;;  %s123_s2 = scalar_lea.hbm %s449_s1, %s191_s28 }
  0x25   : > { %s107_s26 = scalar_lea.vmem [#allocation5], %s189_s25  ;;  %s112_s3 = scalar_lea.sflag [#allocation4], %s105_s24 }
  0x26   : > { %s125_s27 = sshll.u32 %s107_s26, 4  ;;  %110 = vst [vmem:[%s107_s26] sm:$0xff] %v109_v1  ;;  %s337_s5 = smov [#allocation5]   ;;  %s126_s27 = int_to_ptr.vmem [resolvable:$true] %s125_s27 }
  0x27   : > { %s270_s4 = scalar_lea.vmem %s126_s27, 128  ;;  %s274_s11 = sshll.u32 %s337_s5, 4  ;;  %s275_s11 = int_to_ptr.vmem [resolvable:$false] %s274_s11 }
  0x28   : > { %p271_p6 = scmp.ne.s32.totalorder %s126_s27, %s270_s4  ;;  %s276_s13 = scalar_lea.vmem %s275_s11, 256 }
  0x29   : > { %p277_p10 = scmp.lt.s32.totalorder %s126_s27, %s275_s11  ;;  %p278_p11 = scmp.lt.s32.totalorder %s276_s13, %s270_s4 }
  0x2a   : > { %p272_p8 = pnand %p271_p6, %p386_p5 }
  0x2b   : > { %p279_p12 = por %p278_p11, %p277_p10 }
  0x2c   : > { %p273_p9 = pneg %p272_p8 }
  0x2e   : > { %p280_p13 = pnand %p279_p12, %p273_p9 }
  0x30   : > { %283 = shalt.err (!%p280_p13)
}
  0x31   : > { %s284_s10 = scalar_lea.hbm %s123_s2, 128  ;;  %s288_s19 = scalar_lea.hbm %s449_s1, 256 }
  0x32   : > { %p285_p0 = scmp.ne.s32.totalorder %s123_s2, %s284_s10  ;;  %p289_p3 = scmp.lt.s32.totalorder %s123_s2, %s449_s1 }
  0x33   : > { %p290_p4 = scmp.lt.s32.totalorder %s288_s19, %s284_s10 }
  0x34   : > { %p286_p1 = pnand %p285_p0, %p386_p5 }
  0x35   : > { %p291_p7 = por %p290_p4, %p289_p3 }
  0x36   : > { %p287_p2 = pneg %p286_p1 }
  0x38   : > { %p292_p6 = pnand %p291_p7, %p287_p2 }
  0x3a   : > { %295 = shalt.err (!%p292_p6)
}
  0x3b   : > { %198 = dma.vmem_to_hbm [thread:$0]  (%p386_p5), %s126_s27, 128, %s123_s2, %s112_s3  }
  0x3c PF: > { %p210_p8 = scmp.ge.s32.totalorder %s334_s9, 2  ;;  %s137_s22 = sand.u32 1, %s322_s6  }
  0x3d   : > { %p453_p9 = scmp.ne.s32.totalorder %s451_s17, 0  ;;  %s138_s23 = scalar_lea.sflag [#allocation4], %s137_s22 }
  0x3f   : > { %p205_p10 = pnand %p210_p8, %p453_p9 }
  0x41   : > { %p206_p11 = pneg %p205_p10 }
  0x43   : > { %317 = dma.done.wait (%p206_p11), %s138_s23, 128  }
  0x44   : > { %319 = vsyncadd (%p206_p11), %s138_s23, 4294967168  ;;  %p12_p12 = scmp.ge.s32.totalorder %s373_s12, 4   ;;  %s454_s6 = smov %s326_s7 }
  0x45   : > { %s455_s7 = smov %s330_s8  ;;  %s456_s8 = smov %s384_s15 }
  0x46   : > { %s457_s9 = smov %s373_s12  ;;  %14 = sbr.rel (!%p12_p12) target bundleno = 4 (0x4), region = 61 }
  0x4b   :  { %143 = vsyncpa [#allocation3], 1 }
  0x4c   :  { %145 = vsyncpa [#allocation3 + $0x1], 1 }
  0x4d   :  { %146 = vsyncpa [#allocation4], 1 }
  0x4e   :  { %148 = vsyncpa [#allocation4 + $0x1], 1 }

// kernel: tpu_custom_call.1
= control target key start
LH: loop header
LB: loop body
LE: loop exit
PB: predicated region body
PF: predicated region fallthrough
CT: control target
= control target key end

     0   :  { %vm34_vm0 = vcmask 261120   ;;  %s398_s0 = inlined_call_operand.vmem [shape: f32[16,32], index: 0, kind: input, shape index: {}]   ;;  %s399_s1 = inlined_call_operand.vmem [shape: f32[32,64], index: 1, kind: input, shape index: {}]   ;;  %s400_s2 = inlined_call_operand.vmem [shape: f32[1,64], index: 2, kind: input, shape index: {}]   ;;  %s401_s3 = inlined_call_operand.vmem [shape: f32[64,32], index: 3, kind: input, shape index: {}]   ;;  %s402_s4 = inlined_call_operand.vmem [shape: f32[1,32], index: 4, kind: input, shape index: {}]   ;;  %s403_s5 = inlined_call_operand.hbm [shape: f32[16,32], index: 5, kind: output, shape index: {}]  }
   0x1   :  { %v26_v0 = vld [vmem:[%s399_s1 + $0x18] sm:$0xff]  ;;  %v25_v1 = vld [vmem:[%s399_s1 + $0x10] sm:$0xff]  ;;  %v21_v2 = vld [vmem:[%s398_s0] sm:$0xff] }
   0x2   :  { %255 = vmatprep.subr.mxu0 %v26_v0  ;;  %v24_v3 = vld [vmem:[%s399_s1 + $0x8] sm:$0xff]  ;;  %263 = vmatprep.mubr.msk.f32.mxu0 %vm34_vm0, %v21_v2  ;;  %v125_v4 = vld [vmem:[%s401_s3 + $0x38] sm:$0xff]  ;;  %v124_v5 = vld [vmem:[%s401_s3 + $0x30] sm:$0xff] }
   0x3   :  { %256 = vmatpush3.msra.mxu0 %v26_v0  ;;  %266 = vmatprep.subr.mxu1 %v125_v4 }
   0x4   :  { %257 = vmatprep.subr.mxu0 %v25_v1 }
   0x5   :  { %10 = vsyncpa [#allocation3], 0  ;;  %258 = vmatpush3.msra.mxu0 %v25_v1  ;;  %v23_v6 = vld [vmem:[%s399_s1] sm:$0xff]  ;;  %267 = vmatpush3.msra.mxu1 %v125_v4  ;;  %v123_v7 = vld [vmem:[%s401_s3 + $0x28] sm:$0xff]  ;;  %vm133_vm1 = vcmask 523264  }
   0x6   :  { %259 = vmatprep.subr.mxu0 %v24_v3  ;;  %268 = vmatprep.subr.mxu1 %v124_v5  ;;  %v22_v8 = vld [vmem:[%s398_s0 + $0x8] sm:$0xff]  ;;  %v122_v9 = vld [vmem:[%s401_s3 + $0x20] sm:$0xff]  ;;  %v121_v10 = vld [vmem:[%s401_s3 + $0x18] sm:$0xff] }
   0x7   :  { %260 = vmatpush3.msra.mxu0 %v24_v3  ;;  %269 = vmatpush3.msra.mxu1 %v124_v5  ;;  %v120_v11 = vld [vmem:[%s401_s3 + $0x10] sm:$0xff]  ;;  %v119_v12 = vld [vmem:[%s401_s3 + $0x8] sm:$0xff]  ;;  %v118_v13 = vld [vmem:[%s401_s3] sm:$0xff]  ;;  %s310_s3 = smov [#allocation2]  }
   0x8   :  { %261 = vmatprep.subr.mxu0 %v23_v6  ;;  %270 = vmatprep.subr.mxu1 %v123_v7  ;;  %v233_v14 = vld [vmem:[%s400_s2] ss:$0 sm:$0xff]  ;;  %s222_s23 = sshll.u32 %s310_s3, 4  ;;  %s223_s23 = int_to_ptr.vmem [resolvable:$true] %s222_s23 }
   0x9   :  { %262 = vmatpush3.msra.mxu0 %v23_v6  ;;  %271 = vmatpush3.msra.mxu1 %v123_v7  ;;  %v236_v21 = vld [vmem:[%s402_s4] ss:$0 sm:$0xff]  ;;  %s288_s2 = scalar_lea.vmem %s223_s23, 256  ;;  %p293_p1 = scmp.lt.s32.totalorder %s223_s23, %s223_s23 }
   0xa   :  { %264 = vmatmul.mubr.msk.f32.vlgmr.msra.gmra.mxu0 %vm34_vm0, %v22_v8  ;;  %272 = vmatprep.subr.mxu1 %v122_v9  ;;  %p289_p0 = scmp.ne.s32.totalorder %s223_s23, %s288_s2  ;;  %p294_p2 = scmp.lt.s32.totalorder %s288_s2, %s288_s2 }
   0xb   :  { %273 = vmatpush3.msra.mxu1 %v122_v9 }
   0xc   :  { %274 = vmatprep.subr.mxu1 %v121_v10  ;;  %p295_p3 = por %p294_p2, %p293_p1 }
   0xd   :  { %275 = vmatpush3.msra.mxu1 %v121_v10 }
   0xe   :  { %276 = vmatprep.subr.mxu1 %v120_v11  ;;  %p296_p4 = pnand %p295_p3, %p289_p0 }
   0xf   :  { %277 = vmatpush3.msra.mxu1 %v120_v11 }
  0x10   :  { %278 = vmatprep.subr.mxu1 %v119_v12 }
  0x11   :  { %279 = vmatpush3.msra.mxu1 %v119_v12 }
  0x12   :  { %280 = vmatprep.subr.mxu1 %v118_v13 }
  0x13   :  { %281 = vmatpush3.msra.mxu1 %v118_v13 }
  0xca   :  { %v265_v15 = vpop.f32.mrf.mxu0 }
  0xcb   :  { %v113_v16 = vadd.f32 %v265_v15, %v233_v14 }
  0xcc   :  { %v107_v17 = vpop.f32.mrf.mxu0 }
  0xcd   :  { %v108_v18 = vadd.f32 %v233_v14, %v107_v17  ;;  %v117_v20 = vmax.f32 %v113_v16, 0.0 }
  0xcf   :  { %v116_v19 = vmax.f32 %v108_v18, 0.0 }
  0xd1   :  { %282 = vmatprep.mubr.msk.f32.mxu1 %vm133_vm1, %v116_v19 }
  0xd2   :  { %283 = vmatmul.mubr.msk.f32.vlgmr.msra.gmra.mxu1 %vm133_vm1, %v117_v20 }
 0x192   :  { %v284_v22 = vpop.f32.mrf.mxu1 }
 0x193   :  { %v212_v23 = vadd.f32 %v284_v22, %v236_v21 }
 0x194   :  { %v206_v24 = vpop.f32.mrf.mxu1 }
 0x195   :  { %216 = vst.msk [vmem:[#allocation2 + $0x8] sm:$0xff] %vm34_vm0, %v212_v23  ;;  %v207_v25 = vadd.f32 %v236_v21, %v206_v24 }
 0x197   :  { %215 = vst.msk [vmem:[#allocation2] sm:$0xff] %vm34_vm0, %v207_v25 }
 0x198   :  { %299 = shalt.err (!%p296_p4)
}
 0x199   :  { %s311_s24 = smov 128   ;;  %s312_s4 = smov 8  }
 0x19a   :  { %228 = dma.vmem_to_hbm [thread:$0]  %s223_s23, 256, %s403_s5, [#allocation3], %s311_s24, %s311_s24, %s312_s4  }
 0x19b   :  { %308 = dma.done.wait [#allocation3], 256  }
 0x19c   :  { %309 = vsyncadd [#allocation3], 4294967040 }
 0x19d   :  { %232 = vsyncpa [#allocation3], 1 }

</bundles_post_ra>
